<compile_context>
chip_gen: v7x
topology: tpu7x:2x2x1
jax: 0.10.0
libtpu: 0.0.40
codegen_flags: <defaults>
</compile_context>

<pallas_src>
import functools

import jax
import jax.numpy as jnp
from jax import lax
from jax.experimental import pallas as pl
from jax.experimental.pallas import tpu as pltpu


def _round_up(x, m):
    return -(-x // m) * m


def _fused_conv_lrelu_kernel(x_ref, w_ref, b_ref, o_ref, xp_ref, slab_ref, *,
                             C, H, W, Wp, padding, taps, l_out, neg_slope):
    """O[oc, q] = lrelu( sum_{t,c} W[oc, t*C+c] * Xpad[c, q + off_t] + b[oc] ).

    x_ref:    (1, C, H*W)    raw (unpadded) input for one batch element
    w_ref:    (OC, T*C)      bf16 weight, T = KH*KW, K ordered (t, c)
    b_ref:    (OC, 1)        f32 bias
    o_ref:    (1, OC, l_out) lane-dense flat output (channel-major, f32)
    xp_ref:   (C, Lp_pad)    f32 scratch: zero-padded, flattened input
    slab_ref: (T*C, l_out)   f32 scratch: im2col slab
    """
    # --- in-kernel zero padding (replaces the host-side jnp.pad HBM pass) ---
    xp_ref[...] = jnp.zeros_like(xp_ref)          # keeps pad/tail columns zero
    xsrc = x_ref[0].astype(jnp.float32)           # (C, H*W), single VMEM load
    for i in range(H):                            # static unrolled row copies
        dst = (padding + i) * Wp + padding
        xp_ref[:, dst:dst + W] = xsrc[:, i * W:(i + 1) * W]

    # --- im2col: pay the unaligned lane shifts once, into the slab ----------
    xp = xp_ref[...]                              # (C, Lp_pad)
    for t, off in enumerate(taps):                # static unrolled taps
        slab_ref[t * C:(t + 1) * C, :] = xp[:, off:off + l_out]

    # --- one MXU contraction (bf16 operands, f32 accumulation) --------------
    acc = jnp.dot(w_ref[...], slab_ref[...].astype(jnp.bfloat16),
                  preferred_element_type=jnp.float32)      # (OC, l_out)
    acc = acc + b_ref[...]                                  # bias broadcast
    o_ref[0] = jnp.where(acc >= 0.0, acc, neg_slope * acc).astype(o_ref.dtype)


def conv2d_layer_forward(x_nchw, weight, bias, *, stride=1, padding=0,
                         dilation=1):
    """Conv2dLayer forward: ZeroPad2d(padding) -> Conv2d(stride, dilation) -> LeakyReLU(0.2).

    x_nchw: (N, C, H, W), weight: (OC, C, KH, KW), bias: (OC,). Returns (N, OC, OH, OW).
    """
    N, C, H, W = x_nchw.shape
    OC, Cw, KH, KW = weight.shape
    assert C == Cw

    Hp, Wp = H + 2 * padding, W + 2 * padding
    OHf = Hp - dilation * (KH - 1)            # stride-1 ("full") output rows
    OWf = Wp - dilation * (KW - 1)            # stride-1 output cols
    OH = (OHf - 1) // stride + 1
    OW = (OWf - 1) // stride + 1

    taps = tuple(i * dilation * Wp + j * dilation
                 for i in range(KH) for j in range(KW))
    L_out = OHf * Wp                          # flat stride-1 rows of width Wp
    L_out_pad = _round_up(L_out, 128)         # full-lane stores / MXU N dim
    Lp_pad = _round_up(max(max(taps) + L_out_pad, Hp * Wp), 128)

    # Raw flat input: metadata-only reshape, no pad copy, native dtype.
    xflat = x_nchw.reshape(N, C, H * W)

    # (OC, KH*KW*C) bf16 weight with K ordered (t, c) to match the slab rows.
    w2 = jnp.transpose(weight, (0, 2, 3, 1)).reshape(OC, KH * KW * C)
    w2 = w2.astype(jnp.bfloat16)
    b2 = bias.astype(jnp.float32).reshape(OC, 1)

    kern = functools.partial(
        _fused_conv_lrelu_kernel, C=C, H=H, W=W, Wp=Wp, padding=padding,
        taps=taps, l_out=L_out_pad, neg_slope=0.2)

    # TODO(synk): for realistic image sizes, add a second (parallel) grid axis
    # over output-row tiles with a (KH-1)*dilation-row halo so per-step VMEM
    # stays bounded (v7x: 64 MiB physical / 32 MiB scoped) and both v7x
    # TensorCores stay busy when N is small; at this toy size one block per
    # batch element is far under every VMEM limit.
    out_flat = pl.pallas_call(
        kern,
        out_shape=jax.ShapeDtypeStruct((N, OC, L_out_pad), jnp.float32),
        grid_spec=pltpu.PrefetchScalarGridSpec(
            num_scalar_prefetch=0,
            grid=(N,),
            in_specs=[
                pl.BlockSpec((1, C, H * W), lambda n: (n, 0, 0)),
                pl.BlockSpec((OC, KH * KW * C), lambda n: (0, 0)),
                pl.BlockSpec((OC, 1), lambda n: (0, 0)),
            ],
            out_specs=pl.BlockSpec((1, OC, L_out_pad), lambda n: (n, 0, 0)),
            scratch_shapes=[
                pltpu.VMEM((C, Lp_pad), jnp.float32),
                pltpu.VMEM((KH * KW * C, L_out_pad), jnp.float32),
            ],
        ),
        compiler_params=pltpu.CompilerParams(
            dimension_semantics=("parallel",)),
    )(xflat, w2, b2)

    # Crop the wrap-around garbage columns / lane padding and apply stride.
    # TODO(synk): at scale, fuse this crop into the consumer (or mask-store
    # only OWf lanes per row in-kernel) to avoid the extra output round trip;
    # stride>1 currently computes the dense stride-1 output and subsamples.
    out_full = out_flat[:, :, :L_out].reshape(N, OC, OHf, Wp)
    return out_full[:, :, ::stride, 0:OWf:stride]


def _reference(x, weight, bias, *, stride, padding, dilation,
               round_operands_to_bf16):
    xr, wr = x, weight
    if round_operands_to_bf16:
        xr = xr.astype(jnp.bfloat16).astype(jnp.float32)
        wr = wr.astype(jnp.bfloat16).astype(jnp.float32)
    out = lax.conv_general_dilated(
        xr.astype(jnp.float32), wr.astype(jnp.float32),
        window_strides=(stride, stride),
        padding=[(padding, padding), (padding, padding)],
        rhs_dilation=(dilation, dilation),
        dimension_numbers=("NCHW", "OIHW", "NCHW"),
        precision=lax.Precision.HIGHEST)
    out = out + bias.reshape(1, -1, 1, 1).astype(jnp.float32)
    return jnp.where(out >= 0.0, out, 0.2 * out)


if __name__ == "__main__":
    # Module config: Conv2dLayer(in=4, out=8, kernel=3, stride=1, padding=1,
    #   dilation=1, pad_type='zero', activation='lrelu', norm='none', sn=False)
    N, C, H, W = 2, 4, 16, 16
    OC, KH, KW = 8, 3, 3
    stride, padding, dilation = 1, 1, 1

    key = jax.random.PRNGKey(0)
    kx, kw, kb = jax.random.split(key, 3)

    x = jax.random.normal(kx, (N, C, H, W), dtype=jnp.float32)
    # Deterministic parameter init (PyTorch Conv2d-style uniform bound).
    fan_in = C * KH * KW
    bound = 1.0 / (fan_in ** 0.5)
    weight = jax.random.uniform(kw, (OC, C, KH, KW), minval=-bound,
                                maxval=bound, dtype=jnp.float32)
    bias = jax.random.uniform(kb, (OC,), minval=-bound, maxval=bound,
                              dtype=jnp.float32)

    fwd = jax.jit(functools.partial(conv2d_layer_forward, stride=stride,
                                    padding=padding, dilation=dilation))
    out = fwd(x, weight, bias)
    jax.block_until_ready(out)

    assert out.shape == (N, OC, H, W), out.shape

    # Tight check vs a reference using identically bf16-rounded operands
    # (only f32 summation-order differences remain).
    ref_bf = _reference(x, weight, bias, stride=stride, padding=padding,
                        dilation=dilation, round_operands_to_bf16=True)
    err_bf = float(jnp.max(jnp.abs(out - ref_bf)))
    assert err_bf < 2e-3, err_bf

    # Loose sanity check vs the exact f32 reference (bf16 operand rounding).
    ref_f32 = _reference(x, weight, bias, stride=stride, padding=padding,
                         dilation=dilation, round_operands_to_bf16=False)
    err_f32 = float(jnp.max(jnp.abs(out - ref_f32)))
    assert err_f32 < 3e-2, err_f32

    print("KERNEL_OK")
</pallas_src>

<mosaic_0001>
module attributes {stable_mosaic.version = 11 : i64} {
  func.func @_fused_conv_lrelu_kernel(%arg0: i32, %arg1: memref<1x4x256xf32, #tpu.memory_space<vmem>>, %arg2: memref<8x36xbf16, #tpu.memory_space<vmem>>, %arg3: memref<8x1xf32, #tpu.memory_space<vmem>>, %arg4: memref<1x8x384xf32, #tpu.memory_space<vmem>>, %arg5: memref<4x512xf32, #tpu.memory_space<vmem>>, %arg6: memref<36x384xf32, #tpu.memory_space<vmem>>) attributes {dimension_semantics = [#tpu.dimension_semantics<parallel>], iteration_bounds = array<i64: 2>, scalar_prefetch = 0 : i64, scratch_operands = 2 : i64, tpu.core_type = #tpu.core_type<tc>, window_params = [{transform_indices = @transform_0, window_bounds = array<i64: 1, 4, 256>}, {pipeline_mode = #tpu.pipeline_mode<synchronous>, transform_indices = @transform_1, window_bounds = array<i64: 8, 36>}, {pipeline_mode = #tpu.pipeline_mode<synchronous>, transform_indices = @transform_2, window_bounds = array<i64: 8, 1>}, {transform_indices = @transform_3, window_bounds = array<i64: 1, 8, 384>}]} {
    %cst = arith.constant 0.000000e+00 : f32
    %0 = vector.broadcast %cst : f32 to vector<4x512xf32>
    %c0 = arith.constant 0 : index
    %c0_0 = arith.constant 0 : index
    %1 = vector.load %arg5[%c0, %c0_0] : memref<4x512xf32, #tpu.memory_space<vmem>>, vector<4x512xf32>
    tpu.vector_store %arg5[%c0, %c0_0], %0 {strides = array<i32>} : memref<4x512xf32, #tpu.memory_space<vmem>>, vector<4x512xf32>,
    %c0_1 = arith.constant 0 : index
    %c0_2 = arith.constant 0 : index
    %c0_3 = arith.constant 0 : index
    %2 = vector.load %arg1[%c0_1, %c0_2, %c0_3] : memref<1x4x256xf32, #tpu.memory_space<vmem>>, vector<1x4x256xf32>
    %3 = vector.shape_cast %2 : vector<1x4x256xf32> to vector<4x256xf32>
    %4 = vector.extract_strided_slice %3 {offsets = [0, 0], sizes = [4, 16], strides = [1, 1]} : vector<4x256xf32> to vector<4x16xf32>
    %c0_4 = arith.constant 0 : index
    %c19 = arith.constant 19 : index
    %5 = vector.load %arg5[%c0_4, %c19] : memref<4x512xf32, #tpu.memory_space<vmem>>, vector<4x16xf32>
    tpu.vector_store %arg5[%c0_4, %c19], %4 {strides = array<i32>} : memref<4x512xf32, #tpu.memory_space<vmem>>, vector<4x16xf32>,
    %6 = vector.extract_strided_slice %3 {offsets = [0, 16], sizes = [4, 16], strides = [1, 1]} : vector<4x256xf32> to vector<4x16xf32>
    %c0_5 = arith.constant 0 : index
    %c37 = arith.constant 37 : index
    %7 = vector.load %arg5[%c0_5, %c37] : memref<4x512xf32, #tpu.memory_space<vmem>>, vector<4x16xf32>
    tpu.vector_store %arg5[%c0_5, %c37], %6 {strides = array<i32>} : memref<4x512xf32, #tpu.memory_space<vmem>>, vector<4x16xf32>,
    %8 = vector.extract_strided_slice %3 {offsets = [0, 32], sizes = [4, 16], strides = [1, 1]} : vector<4x256xf32> to vector<4x16xf32>
    %c0_6 = arith.constant 0 : index
    %c55 = arith.constant 55 : index
    %9 = vector.load %arg5[%c0_6, %c55] : memref<4x512xf32, #tpu.memory_space<vmem>>, vector<4x16xf32>
    tpu.vector_store %arg5[%c0_6, %c55], %8 {strides = array<i32>} : memref<4x512xf32, #tpu.memory_space<vmem>>, vector<4x16xf32>,
    %10 = vector.extract_strided_slice %3 {offsets = [0, 48], sizes = [4, 16], strides = [1, 1]} : vector<4x256xf32> to vector<4x16xf32>
    %c0_7 = arith.constant 0 : index
    %c73 = arith.constant 73 : index
    %11 = vector.load %arg5[%c0_7, %c73] : memref<4x512xf32, #tpu.memory_space<vmem>>, vector<4x16xf32>
    tpu.vector_store %arg5[%c0_7, %c73], %10 {strides = array<i32>} : memref<4x512xf32, #tpu.memory_space<vmem>>, vector<4x16xf32>,
    %12 = vector.extract_strided_slice %3 {offsets = [0, 64], sizes = [4, 16], strides = [1, 1]} : vector<4x256xf32> to vector<4x16xf32>
    %c0_8 = arith.constant 0 : index
    %c91 = arith.constant 91 : index
    %13 = vector.load %arg5[%c0_8, %c91] : memref<4x512xf32, #tpu.memory_space<vmem>>, vector<4x16xf32>
    tpu.vector_store %arg5[%c0_8, %c91], %12 {strides = array<i32>} : memref<4x512xf32, #tpu.memory_space<vmem>>, vector<4x16xf32>,
    %14 = vector.extract_strided_slice %3 {offsets = [0, 80], sizes = [4, 16], strides = [1, 1]} : vector<4x256xf32> to vector<4x16xf32>
    %c0_9 = arith.constant 0 : index
    %c109 = arith.constant 109 : index
    %15 = vector.load %arg5[%c0_9, %c109] : memref<4x512xf32, #tpu.memory_space<vmem>>, vector<4x16xf32>
    tpu.vector_store %arg5[%c0_9, %c109], %14 {strides = array<i32>} : memref<4x512xf32, #tpu.memory_space<vmem>>, vector<4x16xf32>,
    %16 = vector.extract_strided_slice %3 {offsets = [0, 96], sizes = [4, 16], strides = [1, 1]} : vector<4x256xf32> to vector<4x16xf32>
    %c0_10 = arith.constant 0 : index
    %c127 = arith.constant 127 : index
    %17 = vector.load %arg5[%c0_10, %c127] : memref<4x512xf32, #tpu.memory_space<vmem>>, vector<4x16xf32>
    tpu.vector_store %arg5[%c0_10, %c127], %16 {strides = array<i32>} : memref<4x512xf32, #tpu.memory_space<vmem>>, vector<4x16xf32>,
    %18 = vector.extract_strided_slice %3 {offsets = [0, 112], sizes = [4, 16], strides = [1, 1]} : vector<4x256xf32> to vector<4x16xf32>
    %c0_11 = arith.constant 0 : index
    %c145 = arith.constant 145 : index
    %19 = vector.load %arg5[%c0_11, %c145] : memref<4x512xf32, #tpu.memory_space<vmem>>, vector<4x16xf32>
    tpu.vector_store %arg5[%c0_11, %c145], %18 {strides = array<i32>} : memref<4x512xf32, #tpu.memory_space<vmem>>, vector<4x16xf32>,
    %20 = vector.extract_strided_slice %3 {offsets = [0, 128], sizes = [4, 16], strides = [1, 1]} : vector<4x256xf32> to vector<4x16xf32>
    %c0_12 = arith.constant 0 : index
    %c163 = arith.constant 163 : index
    %21 = vector.load %arg5[%c0_12, %c163] : memref<4x512xf32, #tpu.memory_space<vmem>>, vector<4x16xf32>
    tpu.vector_store %arg5[%c0_12, %c163], %20 {strides = array<i32>} : memref<4x512xf32, #tpu.memory_space<vmem>>, vector<4x16xf32>,
    %22 = vector.extract_strided_slice %3 {offsets = [0, 144], sizes = [4, 16], strides = [1, 1]} : vector<4x256xf32> to vector<4x16xf32>
    %c0_13 = arith.constant 0 : index
    %c181 = arith.constant 181 : index
    %23 = vector.load %arg5[%c0_13, %c181] : memref<4x512xf32, #tpu.memory_space<vmem>>, vector<4x16xf32>
    tpu.vector_store %arg5[%c0_13, %c181], %22 {strides = array<i32>} : memref<4x512xf32, #tpu.memory_space<vmem>>, vector<4x16xf32>,
    %24 = vector.extract_strided_slice %3 {offsets = [0, 160], sizes = [4, 16], strides = [1, 1]} : vector<4x256xf32> to vector<4x16xf32>
    %c0_14 = arith.constant 0 : index
    %c199 = arith.constant 199 : index
    %25 = vector.load %arg5[%c0_14, %c199] : memref<4x512xf32, #tpu.memory_space<vmem>>, vector<4x16xf32>
    tpu.vector_store %arg5[%c0_14, %c199], %24 {strides = array<i32>} : memref<4x512xf32, #tpu.memory_space<vmem>>, vector<4x16xf32>,
    %26 = vector.extract_strided_slice %3 {offsets = [0, 176], sizes = [4, 16], strides = [1, 1]} : vector<4x256xf32> to vector<4x16xf32>
    %c0_15 = arith.constant 0 : index
    %c217 = arith.constant 217 : index
    %27 = vector.load %arg5[%c0_15, %c217] : memref<4x512xf32, #tpu.memory_space<vmem>>, vector<4x16xf32>
    tpu.vector_store %arg5[%c0_15, %c217], %26 {strides = array<i32>} : memref<4x512xf32, #tpu.memory_space<vmem>>, vector<4x16xf32>,
    %28 = vector.extract_strided_slice %3 {offsets = [0, 192], sizes = [4, 16], strides = [1, 1]} : vector<4x256xf32> to vector<4x16xf32>
    %c0_16 = arith.constant 0 : index
    %c235 = arith.constant 235 : index
    %29 = vector.load %arg5[%c0_16, %c235] : memref<4x512xf32, #tpu.memory_space<vmem>>, vector<4x16xf32>
    tpu.vector_store %arg5[%c0_16, %c235], %28 {strides = array<i32>} : memref<4x512xf32, #tpu.memory_space<vmem>>, vector<4x16xf32>,
    %30 = vector.extract_strided_slice %3 {offsets = [0, 208], sizes = [4, 16], strides = [1, 1]} : vector<4x256xf32> to vector<4x16xf32>
    %c0_17 = arith.constant 0 : index
    %c253 = arith.constant 253 : index
    %31 = vector.load %arg5[%c0_17, %c253] : memref<4x512xf32, #tpu.memory_space<vmem>>, vector<4x16xf32>
    tpu.vector_store %arg5[%c0_17, %c253], %30 {strides = array<i32>} : memref<4x512xf32, #tpu.memory_space<vmem>>, vector<4x16xf32>,
    %32 = vector.extract_strided_slice %3 {offsets = [0, 224], sizes = [4, 16], strides = [1, 1]} : vector<4x256xf32> to vector<4x16xf32>
    %c0_18 = arith.constant 0 : index
    %c271 = arith.constant 271 : index
    %33 = vector.load %arg5[%c0_18, %c271] : memref<4x512xf32, #tpu.memory_space<vmem>>, vector<4x16xf32>
    tpu.vector_store %arg5[%c0_18, %c271], %32 {strides = array<i32>} : memref<4x512xf32, #tpu.memory_space<vmem>>, vector<4x16xf32>,
    %34 = vector.extract_strided_slice %3 {offsets = [0, 240], sizes = [4, 16], strides = [1, 1]} : vector<4x256xf32> to vector<4x16xf32>
    %c0_19 = arith.constant 0 : index
    %c289 = arith.constant 289 : index
    %35 = vector.load %arg5[%c0_19, %c289] : memref<4x512xf32, #tpu.memory_space<vmem>>, vector<4x16xf32>
    tpu.vector_store %arg5[%c0_19, %c289], %34 {strides = array<i32>} : memref<4x512xf32, #tpu.memory_space<vmem>>, vector<4x16xf32>,
    %c0_20 = arith.constant 0 : index
    %c0_21 = arith.constant 0 : index
    %36 = vector.load %arg5[%c0_20, %c0_21] : memref<4x512xf32, #tpu.memory_space<vmem>>, vector<4x512xf32>
    %37 = vector.extract_strided_slice %36 {offsets = [0, 0], sizes = [4, 384], strides = [1, 1]} : vector<4x512xf32> to vector<4x384xf32>
    %c0_22 = arith.constant 0 : index
    %c0_23 = arith.constant 0 : index
    %38 = vector.load %arg6[%c0_22, %c0_23] : memref<36x384xf32, #tpu.memory_space<vmem>>, vector<4x384xf32>
    tpu.vector_store %arg6[%c0_22, %c0_23], %37 {strides = array<i32>} : memref<36x384xf32, #tpu.memory_space<vmem>>, vector<4x384xf32>,
    %39 = vector.extract_strided_slice %36 {offsets = [0, 1], sizes = [4, 384], strides = [1, 1]} : vector<4x512xf32> to vector<4x384xf32>
    %c4 = arith.constant 4 : index
    %c0_24 = arith.constant 0 : index
    %40 = vector.load %arg6[%c4, %c0_24] : memref<36x384xf32, #tpu.memory_space<vmem>>, vector<4x384xf32>
    tpu.vector_store %arg6[%c4, %c0_24], %39 {strides = array<i32>} : memref<36x384xf32, #tpu.memory_space<vmem>>, vector<4x384xf32>,
    %41 = vector.extract_strided_slice %36 {offsets = [0, 2], sizes = [4, 384], strides = [1, 1]} : vector<4x512xf32> to vector<4x384xf32>
    %c8 = arith.constant 8 : index
    %c0_25 = arith.constant 0 : index
    %42 = vector.load %arg6[%c8, %c0_25] : memref<36x384xf32, #tpu.memory_space<vmem>>, vector<4x384xf32>
    tpu.vector_store %arg6[%c8, %c0_25], %41 {strides = array<i32>} : memref<36x384xf32, #tpu.memory_space<vmem>>, vector<4x384xf32>,
    %43 = vector.extract_strided_slice %36 {offsets = [0, 18], sizes = [4, 384], strides = [1, 1]} : vector<4x512xf32> to vector<4x384xf32>
    %c12 = arith.constant 12 : index
    %c0_26 = arith.constant 0 : index
    %44 = vector.load %arg6[%c12, %c0_26] : memref<36x384xf32, #tpu.memory_space<vmem>>, vector<4x384xf32>
    tpu.vector_store %arg6[%c12, %c0_26], %43 {strides = array<i32>} : memref<36x384xf32, #tpu.memory_space<vmem>>, vector<4x384xf32>,
    %45 = vector.extract_strided_slice %36 {offsets = [0, 19], sizes = [4, 384], strides = [1, 1]} : vector<4x512xf32> to vector<4x384xf32>
    %c16 = arith.constant 16 : index
    %c0_27 = arith.constant 0 : index
    %46 = vector.load %arg6[%c16, %c0_27] : memref<36x384xf32, #tpu.memory_space<vmem>>, vector<4x384xf32>
    tpu.vector_store %arg6[%c16, %c0_27], %45 {strides = array<i32>} : memref<36x384xf32, #tpu.memory_space<vmem>>, vector<4x384xf32>,
    %47 = vector.extract_strided_slice %36 {offsets = [0, 20], sizes = [4, 384], strides = [1, 1]} : vector<4x512xf32> to vector<4x384xf32>
    %c20 = arith.constant 20 : index
    %c0_28 = arith.constant 0 : index
    %48 = vector.load %arg6[%c20, %c0_28] : memref<36x384xf32, #tpu.memory_space<vmem>>, vector<4x384xf32>
    tpu.vector_store %arg6[%c20, %c0_28], %47 {strides = array<i32>} : memref<36x384xf32, #tpu.memory_space<vmem>>, vector<4x384xf32>,
    %49 = vector.extract_strided_slice %36 {offsets = [0, 36], sizes = [4, 384], strides = [1, 1]} : vector<4x512xf32> to vector<4x384xf32>
    %c24 = arith.constant 24 : index
    %c0_29 = arith.constant 0 : index
    %50 = vector.load %arg6[%c24, %c0_29] : memref<36x384xf32, #tpu.memory_space<vmem>>, vector<4x384xf32>
    tpu.vector_store %arg6[%c24, %c0_29], %49 {strides = array<i32>} : memref<36x384xf32, #tpu.memory_space<vmem>>, vector<4x384xf32>,
    %51 = vector.extract_strided_slice %36 {offsets = [0, 37], sizes = [4, 384], strides = [1, 1]} : vector<4x512xf32> to vector<4x384xf32>
    %c28 = arith.constant 28 : index
    %c0_30 = arith.constant 0 : index
    %52 = vector.load %arg6[%c28, %c0_30] : memref<36x384xf32, #tpu.memory_space<vmem>>, vector<4x384xf32>
    tpu.vector_store %arg6[%c28, %c0_30], %51 {strides = array<i32>} : memref<36x384xf32, #tpu.memory_space<vmem>>, vector<4x384xf32>,
    %53 = vector.extract_strided_slice %36 {offsets = [0, 38], sizes = [4, 384], strides = [1, 1]} : vector<4x512xf32> to vector<4x384xf32>
    %c32 = arith.constant 32 : index
    %c0_31 = arith.constant 0 : index
    %54 = vector.load %arg6[%c32, %c0_31] : memref<36x384xf32, #tpu.memory_space<vmem>>, vector<4x384xf32>
    tpu.vector_store %arg6[%c32, %c0_31], %53 {strides = array<i32>} : memref<36x384xf32, #tpu.memory_space<vmem>>, vector<4x384xf32>,
    %c0_32 = arith.constant 0 : index
    %c0_33 = arith.constant 0 : index
    %55 = vector.load %arg2[%c0_32, %c0_33] : memref<8x36xbf16, #tpu.memory_space<vmem>>, vector<8x36xbf16>
    %c0_34 = arith.constant 0 : index
    %c0_35 = arith.constant 0 : index
    %56 = vector.load %arg6[%c0_34, %c0_35] : memref<36x384xf32, #tpu.memory_space<vmem>>, vector<36x384xf32>
    %57 = arith.truncf %56 : vector<36x384xf32> to vector<36x384xbf16>
    %cst_36 = arith.constant dense<0.000000e+00> : vector<8x384xf32>
    %58 = tpu.matmul %55, %57, %cst_36 {dimension_numbers = #tpu.dot_dimension_numbers<[1], [0], [0], [1], [0, 0, 1, 1], [], []>} : vector<8x36xbf16>, vector<36x384xbf16>, vector<8x384xf32> -> vector<8x384xf32>
    %c0_37 = arith.constant 0 : index
    %c0_38 = arith.constant 0 : index
    %59 = vector.load %arg3[%c0_37, %c0_38] : memref<8x1xf32, #tpu.memory_space<vmem>>, vector<8x1xf32>
    %60 = vector.broadcast %59 : vector<8x1xf32> to vector<8x384xf32>
    %61 = arith.addf %58, %60 : vector<8x384xf32>
    %cst_39 = arith.constant 0.000000e+00 : f32
    %62 = vector.broadcast %cst_39 : f32 to vector<8x384xf32>
    %63 = arith.cmpf oge, %61, %62 : vector<8x384xf32>
    %cst_40 = arith.constant 2.000000e-01 : f32
    %64 = vector.broadcast %cst_40 : f32 to vector<8x384xf32>
    %65 = arith.mulf %64, %61 : vector<8x384xf32>
    %66 = arith.select %63, %61, %65 : vector<8x384xi1>, vector<8x384xf32>
    %c0_41 = arith.constant 0 : index
    %c0_42 = arith.constant 0 : index
    %c0_43 = arith.constant 0 : index
    %67 = vector.load %arg4[%c0_41, %c0_42, %c0_43] : memref<1x8x384xf32, #tpu.memory_space<vmem>>, vector<1x8x384xf32>
    %68 = vector.shape_cast %67 : vector<1x8x384xf32> to vector<8x384xf32>
    %69 = vector.shape_cast %66 : vector<8x384xf32> to vector<1x8x384xf32>
    tpu.vector_store %arg4[%c0_41, %c0_42, %c0_43], %69 {strides = array<i32>} : memref<1x8x384xf32, #tpu.memory_space<vmem>>, vector<1x8x384xf32>,
    return
  }
  func.func @transform_0(%arg0: i32) -> (i32, i32, i32) {
    %c0_i32 = arith.constant 0 : i32
    %c0_i32_0 = arith.constant 0 : i32
    %c0_i32_1 = arith.constant 0 : i32
    return %arg0, %c0_i32, %c0_i32_0 : i32, i32, i32
  }
  func.func @transform_1(%arg0: i32) -> (i32, i32) {
    %c0_i32 = arith.constant 0 : i32
    %c0_i32_0 = arith.constant 0 : i32
    %c0_i32_1 = arith.constant 0 : i32
    return %c0_i32, %c0_i32_0 : i32, i32
  }
  func.func @transform_2(%arg0: i32) -> (i32, i32) {
    %c0_i32 = arith.constant 0 : i32
    %c0_i32_0 = arith.constant 0 : i32
    %c0_i32_1 = arith.constant 0 : i32
    return %c0_i32, %c0_i32_0 : i32, i32
  }
  func.func @transform_3(%arg0: i32) -> (i32, i32, i32) {
    %c0_i32 = arith.constant 0 : i32
    %c0_i32_0 = arith.constant 0 : i32
    %c0_i32_1 = arith.constant 0 : i32
    return %arg0, %c0_i32, %c0_i32_0 : i32, i32, i32
  }
}

</mosaic_0001>

<bundles_post_ra>
// kernel: conv2d_layer_forward.1
= control target key start
LH: loop header
LB: loop body
LE: loop exit
PB: predicated region body
PF: predicated region fallthrough
CT: control target
= control target key end

     0   :  { %s756_s12 = smov 0   ;;  %s833_s0 = inlined_call_operand.vmem [shape: f32[2,4,256], index: 0, kind: input, shape index: {}]   ;;  %s834_s1 = inlined_call_operand.vmem [shape: bf16[8,36], index: 1, kind: input, shape index: {}]   ;;  %s835_s2 = inlined_call_operand.vmem [shape: f32[8,1], index: 2, kind: input, shape index: {}]   ;;  %s836_s3 = inlined_call_operand.vmem [shape: f32[2,8,384], index: 3, kind: output, shape index: {}]  }
   0x1 LB: > { %s632_s13 = sadd.s32 4294967295, %s707_s12   ;;  %p636_p0 = scmp.ge.s32.totalorder %s707_s12, 1  ;;  %s707_s12 = sphi %s756_s12, %s13_s12  }
   0x2   : > { %p137_p1 = scmp.lt.s32.totalorder %s707_s12, 3 }
   0x4   : > { %p138_p2 = pnand %p636_p0, %p137_p1 }
   0x5   : > { %p161_p3 = scmp.lt.s32.totalorder (!%p138_p2), %s632_s13, 1  ;;  %v709_v0 = vmov (!%p138_p2), 0.0   ;;  %s710_s18 = smov (!%p138_p2), 23   ;;  %vm179_vm0 = vcmask (!%p138_p2), 281752   ;;  %vm184_vm1 = vcmask (!%p138_p2), 429352   ;;  %vm189_vm2 = vcmask (!%p138_p2), 576952  }
   0x6   : > { %141 = sbr.rel (%p138_p2) target bundleno = 577 (0x241), region = 32  ;;  %172 = vst [vmem:[#allocation2] sm:$0xff] (!%p138_p2), %v709_v0  ;;  %173 = vst [vmem:[#allocation2 + $0x8] sm:$0xff] (!%p138_p2), %v709_v0  ;;  %650 = vmatprep.subr.bf16.mxu1 (!%p138_p2), %v709_v0  ;;  %s711_s19 = smov (!%p138_p2), 19   ;;  %vm194_vm3 = vcmask (!%p138_p2), 724552   ;;  %vm199_vm4 = vcmask (!%p138_p2), 872152  }
   0x7   : > { %s712_s20 = smov (!%p138_p2), 25   ;;  %s713_s21 = smov (!%p138_p2), 21   ;;  %vm212_vm5 = vcmask (!%p138_p2), 1044472   ;;  %vm213_vm6 = vcmask (!%p138_p2), 121860   ;;  %vm209_vm7 = vcmask (!%p138_p2), 252928   ;;  %vm204_vm8 = vcmask (!%p138_p2), 1019752  }
   0x8   : > { %s714_s22 = smov (!%p138_p2), 27   ;;  %s715_s23 = smov (!%p138_p2), 31   ;;  %vm214_vm9 = vmor (!%p138_p2), %vm213_vm6, %vm212_vm5  ;;  %vm224_vm10 = vcmask (!%p138_p2), 285696   ;;  %vm219_vm11 = vcmask (!%p138_p2), 265352   ;;  %vm227_vm12 = vcmask (!%p138_p2), 412952   ;;  %vm232_vm13 = vcmask (!%p138_p2), 302080  }
   0x9   : > { %s716_s24 = smov (!%p138_p2), 35   ;;  %s717_s25 = smov (!%p138_p2), 29   ;;  %vm235_vm14 = vcmask (!%p138_p2), 560552   ;;  %vm248_vm15 = vcmask (!%p138_p2), 334848   ;;  %vm264_vm5 = vcmask (!%p138_p2), 367616   ;;  %vm256_vm6 = vcmask (!%p138_p2), 351232  }
   0xa   : > { %s718_s26 = smov (!%p138_p2), 33   ;;  %s719_s27 = smov (!%p138_p2), 37   ;;  %v734_v40 = vmov (!%p138_p2), 0   ;;  %v464_v41 = vld [vmem:[%s835_s2] sm:$0xff] (!%p138_p2) }
   0xb   : > { %s720_s28 = smov (!%p138_p2), 41   ;;  %s721_s29 = smov (!%p138_p2), 39   ;;  %516 = vmatprep.mubr.bf16.mxu0 (!%p138_p2), %v734_v40  ;;  %696 = vset.pattern.permute.xlu0 (!%p138_p2), %v734_v40 }
   0xc   : > { %s722_s30 = smov (!%p138_p2), 45   ;;  %s723_s4 = smov (!%p138_p2), 43  }
   0xd   : > { %s838_s13 = smov (!%p161_p3, %s632_s13), 1  ;;  %s724_s5 = smov 47  }
   0xe   : > { %s645_s14 = sshll.u32 %s838_s13, 3  ;;  %s725_s6 = smov 49  }
   0xf   : > { %s165_s17 = scalar_lea.vmem %s833_s0, %s645_s14  ;;  %s726_s7 = smov 126  }
  0x10   : > { %v174_v1 = vld [vmem:[%s165_s17] sm:$0xff]  ;;  %s727_s8 = smov 127   ;;  %s728_s9 = smov 110  }
  0x11   : > { %186 = vrot.lane.b32.xlu1 %v174_v1, %s710_s18  ;;  %176 = vrot.lane.b32.xlu0 %v174_v1, %s711_s19  ;;  %s729_s10 = smov 108   ;;  %s730_s11 = smov 91  }
  0x12   : > { %s731_s14 = smov 109   ;;  %s732_s15 = smov 92  }
  0x13   : > { %s733_s16 = smov 90  }
  0x15   : > { %191 = vrot.lane.b32.xlu1 %v174_v1, %s712_s20  ;;  %181 = vrot.lane.b32.xlu0 %v174_v1, %s713_s21  ;;  %s660_s21 = smul.u32 24, %s838_s13 }
  0x19   : > { %196 = vrot.lane.b32.xlu1 %v174_v1, %s714_s22  ;;  %206 = vrot.lane.b32.xlu0 %v174_v1, %s715_s23 }
  0x1d   : > { %221 = vrot.lane.b32.xlu1 %v174_v1, %s716_s24  ;;  %201 = vrot.lane.b32.xlu0 %v174_v1, %s717_s25  ;;  %s170_s24 = scalar_lea.vmem %s836_s3, %s660_s21 }
  0x21   : > { %216 = vrot.lane.b32.xlu1 %v174_v1, %s718_s26  ;;  %229 = vrot.lane.b32.xlu0 %v174_v1, %s719_s27 }
  0x25   : > { %245 = vrot.lane.b32.xlu1 %v174_v1, %s720_s28  ;;  %237 = vrot.lane.b32.xlu0 %v174_v1, %s721_s29 }
  0x29   : > { %261 = vrot.lane.b32.xlu1 %v174_v1, %s722_s30  ;;  %253 = vrot.lane.b32.xlu0 %v174_v1, %s723_s4 }
  0x2d   : > { %271 = vrot.lane.b32.xlu0 %v174_v1, %s724_s5  ;;  %277 = vrot.lane.b32.xlu1 %v174_v1, %s725_s6 }
  0x83   : > { %v187_v2 = vpop.permute.xlu1 %186  ;;  %v177_v3 = vpop.permute.xlu0 %176 }
  0x84   : > { %180 = vst.msk [vmem:[#allocation2] sm:$0xf] %vm179_vm0, %v177_v3  ;;  %vm240_vm0 = vcmask 318464  }
  0x87   : > { %v192_v4 = vpop.permute.xlu1 %191  ;;  %v182_v5 = vpop.permute.xlu0 %181 }
  0x88   : > { %185 = vst.msk [vmem:[#allocation2] sm:$0xf] %vm184_vm1, %v182_v5  ;;  %vm243_vm1 = vcmask 708152  }
  0x89   : > { %190 = vst.msk [vmem:[#allocation2] sm:$0xf] %vm189_vm2, %v187_v2  ;;  %vm251_vm2 = vcmask 855752  }
  0x8a   : > { %195 = vst.msk [vmem:[#allocation2] sm:$0xf] %vm194_vm3, %v192_v4  ;;  %vm267_vm3 = vcmask 1044456  }
  0x8b   : > { %v197_v6 = vpop.permute.xlu1 %196  ;;  %v207_v7 = vpop.permute.xlu0 %206 }
  0x8c   : > { %200 = vst.msk [vmem:[#allocation2] sm:$0xf] %vm199_vm4, %v197_v6  ;;  %v208_v8 = vrot.slane %v207_v7, 4  ;;  %vm268_vm4 = vcmask 105476  }
  0x8e   : > { %v210_v11 = vsel %vm209_vm7, %v208_v8, %v207_v7  ;;  %vm259_vm7 = vcmask 1003352  }
  0x8f   : > { %v222_v9 = vpop.permute.xlu1 %221  ;;  %v202_v10 = vpop.permute.xlu0 %201 }
  0x90   : > { %v223_v12 = vrot.slane %v222_v9, 4  ;;  %205 = vst.msk [vmem:[#allocation2] sm:$0xf] %vm204_vm8, %v202_v10  ;;  %vm269_vm8 = vmor %vm268_vm4, %vm267_vm3  ;;  %vm429_vm3 = vcmask 736256   ;;  %vm474_vm4 = vcmask 1041408  }
  0x91   : > { %215 = vst.msk [vmem:[#allocation2] sm:$0xff] %vm214_vm9, %v210_v11  ;;  %vm275_vm9 = vcmask 248952  }
  0x92   : > { %v225_v15 = vsel %vm224_vm10, %v222_v9, %v223_v12  ;;  %vm281_vm10 = vcmask 396552  }
  0x93   : > { %v217_v13 = vpop.permute.xlu1 %216  ;;  %v230_v14 = vpop.permute.xlu0 %229 }
  0x94   : > { %220 = vst.msk [vmem:[#allocation2 + $0x4] sm:$0xf] %vm219_vm11, %v217_v13  ;;  %v231_v16 = vrot.slane %v230_v14, 4  ;;  %vm735_vm11 = vmmov 0  }
  0x95   : > { %228 = vst.msk [vmem:[#allocation2 + $0x4] sm:$0xf] %vm227_vm12, %v225_v15  ;;  %656 = vmatprep.mubr.msk.bf16.mxu1 %vm735_vm11, %v709_v0  ;;  %vm375_vm12 = vcmask 883712  }
  0x96   : > { %v233_v17 = vsel %vm232_vm13, %v230_v14, %v231_v16  ;;  %vm411_vm13 = vcmask 744448  }
  0x97   : > { %236 = vst.msk [vmem:[#allocation2 + $0x4] sm:$0xf] %vm235_vm14, %v233_v17  ;;  %v246_v18 = vpop.permute.xlu1 %245  ;;  %v238_v19 = vpop.permute.xlu0 %237  ;;  %vm321_vm14 = vcmask 1031168  }
  0x98   : > { %v247_v20 = vrot.slane %v246_v18, 4  ;;  %v239_v21 = vrot.slane %v238_v19, 4 }
  0x9a   : > { %v249_v22 = vsel %vm248_vm15, %v246_v18, %v247_v20  ;;  %v241_v23 = vsel %vm240_vm0, %v238_v19, %v239_v21  ;;  %vm302_vm15 = vcmask 1039360   ;;  %vm339_vm0 = vcmask 900096  }
  0x9b   : > { %244 = vst.msk [vmem:[#allocation2 + $0x4] sm:$0xf] %vm243_vm1, %v241_v23  ;;  %v262_v24 = vpop.permute.xlu1 %261  ;;  %v254_v25 = vpop.permute.xlu0 %253  ;;  %vm357_vm1 = vcmask 891904  }
  0x9c   : > { %v263_v26 = vrot.slane %v262_v24, 4  ;;  %252 = vst.msk [vmem:[#allocation2 + $0x4] sm:$0xf] %vm251_vm2, %v249_v22  ;;  %v255_v27 = vrot.slane %v254_v25, 4  ;;  %vm393_vm2 = vcmask 752640  }
  0x9e   : > { %v265_v28 = vsel %vm264_vm5, %v262_v24, %v263_v26  ;;  %v257_v29 = vsel %vm256_vm6, %v254_v25, %v255_v27  ;;  %vm470_vm5 = vcmask 293888  }
  0x9f   : > { %260 = vst.msk [vmem:[#allocation2 + $0x4] sm:$0xf] %vm259_vm7, %v257_v29  ;;  %v272_v30 = vpop.permute.xlu0 %271  ;;  %v278_v31 = vpop.permute.xlu1 %277 }
  0xa0   : > { %270 = vst.msk [vmem:[#allocation2 + $0x4] sm:$0xff] %vm269_vm8, %v265_v28  ;;  %v273_v32 = vrot.slane %v272_v30, 4  ;;  %v279_v33 = vrot.slane %v278_v31, 4 }
  0xa2   : > { %276 = vst.msk [vmem:[#allocation2 + $0x8] sm:$0xf] %vm275_vm9, %v273_v32 }
  0xa3   : > { %282 = vst.msk [vmem:[#allocation2 + $0x8] sm:$0xf] %vm281_vm10, %v279_v33 }
  0xa7   : > { %v283_v34 = vld [vmem:[#allocation2] sm:$0xff] }
  0xa8   : > { %313 = vrot.lane.b32.xlu1 %v283_v34, %s726_s7  ;;  %289 = vst [vmem:[#allocation3] sm:$0xf] %v283_v34  ;;  %296 = vrot.lane.b32.xlu0 %v283_v34, %s727_s8  ;;  %v287_v35 = vcombine.high %v283_v34, %v283_v34  ;;  %v292_v37 = vcombine.low %v283_v34, %v283_v34 }
  0xaa   : > { %v284_v36 = vld [vmem:[#allocation2 + $0x8] sm:$0xff]  ;;  %290 = vst [vmem:[#allocation3 + $0x8] sm:$0xf] %v287_v35 }
  0xab   : > { %291 = vst [vmem:[#allocation3 + $0x10] sm:$0xf] %v284_v36  ;;  %v293_v38 = vcombine.low %v284_v36, %v284_v36  ;;  %v312_v39 = vcombine.high %v284_v36, %v284_v36 }
  0xac   : > { %333 = vrot.lane.b32.xlu0 %v283_v34, %s728_s9  ;;  %317 = vrot.lane.b32.xlu1 %v284_v36, %s726_s7 }
  0xb0   : > { %369 = vrot.lane.b32.xlu0 %v283_v34, %s729_s10  ;;  %300 = vrot.lane.b32.xlu1 %v284_v36, %s727_s8 }
  0xb4   : > { %405 = vrot.lane.b32.xlu0 %v283_v34, %s730_s11  ;;  %337 = vrot.lane.b32.xlu1 %v284_v36, %s728_s9 }
  0xb8   : > { %349 = vrot.lane.b32.xlu0 %v283_v34, %s731_s14  ;;  %353 = vrot.lane.b32.xlu1 %v284_v36, %s731_s14 }
  0xbc   : > { %385 = vrot.lane.b32.xlu0 %v283_v34, %s732_s15  ;;  %389 = vrot.lane.b32.xlu1 %v284_v36, %s732_s15 }
  0xc0   : > { %421 = vrot.lane.b32.xlu0 %v283_v34, %s733_s16  ;;  %367 = vrot.lane.b32.xlu1 %v292_v37, %s729_s10 }
  0xc4   : > { %315 = vrot.lane.b32.xlu0 %v287_v35, %s726_s7  ;;  %403 = vrot.lane.b32.xlu1 %v292_v37, %s730_s11 }
  0xc8   : > { %294 = vrot.lane.b32.xlu0 %v292_v37, %s727_s8  ;;  %373 = vrot.lane.b32.xlu1 %v284_v36, %s729_s10 }
  0xcc   : > { %331 = vrot.lane.b32.xlu0 %v292_v37, %s728_s9  ;;  %409 = vrot.lane.b32.xlu1 %v284_v36, %s730_s11 }
  0xd0   : > { %351 = vrot.lane.b32.xlu0 %v287_v35, %s731_s14  ;;  %298 = vrot.lane.b32.xlu1 %v293_v38, %s727_s8 }
  0xd4   : > { %387 = vrot.lane.b32.xlu0 %v287_v35, %s732_s15  ;;  %335 = vrot.lane.b32.xlu1 %v293_v38, %s728_s9 }
  0xd8   : > { %319 = vrot.lane.b32.xlu0 %v312_v39, %s726_s7  ;;  %371 = vrot.lane.b32.xlu1 %v293_v38, %s729_s10 }
  0xdc   : > { %355 = vrot.lane.b32.xlu0 %v312_v39, %s731_s14  ;;  %407 = vrot.lane.b32.xlu1 %v293_v38, %s730_s11 }
  0xe0   : > { %391 = vrot.lane.b32.xlu0 %v312_v39, %s732_s15  ;;  %423 = vrot.lane.b32.xlu1 %v287_v35, %s733_s16 }
  0xe4   : > { %425 = vrot.lane.b32.xlu0 %v284_v36, %s733_s16  ;;  %427 = vrot.lane.b32.xlu1 %v312_v39, %s733_s16 }
  0xe8   : > { %467 = vperm.xlu0 %696, %v464_v41  }
 0x11a   : > { %v314_v42 = vpop.permute.xlu1 %313  ;;  %v297_v43 = vpop.permute.xlu0 %296 }
 0x11e   : > { %v318_v44 = vpop.permute.xlu1 %317  ;;  %v334_v45 = vpop.permute.xlu0 %333 }
 0x122   : > { %v301_v46 = vpop.permute.xlu1 %300  ;;  %v370_v47 = vpop.permute.xlu0 %369 }
 0x126   : > { %v338_v48 = vpop.permute.xlu1 %337  ;;  %v785_v49 = vpop.permute.xlu0 %405 }
 0x12a   : > { %v787_v50 = vpop.permute.xlu1 %353  ;;  %v350_v51 = vpop.permute.xlu0 %349 }
 0x12e   : > { %v789_v52 = vpop.permute.xlu1 %389  ;;  %v386_v53 = vpop.permute.xlu0 %385 }
 0x132   : > { %v368_v54 = vpop.permute.xlu1 %367  ;;  %v791_v55 = vpop.permute.xlu0 %421 }
 0x133   : > { %v376_v56 = vsel %vm375_vm12, %v368_v54, %v370_v47 }
 0x134   : > { %382 = vst [vmem:[#allocation3 + $0x30] sm:$0xf0] %v376_v56 }
 0x136   : > { %v404_v57 = vpop.permute.xlu1 %403  ;;  %v316_v58 = vpop.permute.xlu0 %315 }
 0x137   : > { %v412_v59 = vsel %vm411_vm13, %v404_v57, %v785_v49  ;;  %v322_v60 = vsel %vm321_vm14, %v314_v42, %v316_v58  ;;  %v323_v61 = vsel %vm321_vm14, %v316_v58, %v318_v44 }
 0x138   : > { %418 = vst [vmem:[#allocation3 + $0x48] sm:$0xf0] %v412_v59  ;;  %328 = vst [vmem:[#allocation3 + $0x18] sm:$0xf] %v322_v60 }
 0x139   : > { %329 = vst [vmem:[#allocation3 + $0x20] sm:$0xf] %v323_v61  ;;  %v439_v61 = vld [vmem:[%s834_s1] sm:$0xf] }
 0x13a   : > { %v374_v62 = vpop.permute.xlu1 %373  ;;  %v295_v63 = vpop.permute.xlu0 %294 }
 0x13b   : > { %v303_v1 = vsel %vm302_vm15, %v295_v63, %v297_v43 }
 0x13c   : > { %309 = vst [vmem:[#allocation3] sm:$0xf0] %v303_v1 }
 0x13e   : > { %v410_v2 = vpop.permute.xlu1 %409  ;;  %v332_v3 = vpop.permute.xlu0 %331 }
 0x13f   : > { %v340_v4 = vsel %vm339_vm0, %v332_v3, %v334_v45 }
 0x140   : > { %346 = vst [vmem:[#allocation3 + $0x18] sm:$0xf0] %v340_v4 }
 0x142   : > { %v299_v5 = vpop.permute.xlu1 %298  ;;  %v352_v6 = vpop.permute.xlu0 %351 }
 0x143   : > { %v304_v7 = vsel %vm302_vm15, %v297_v43, %v299_v5  ;;  %v305_v8 = vsel %vm302_vm15, %v299_v5, %v301_v46  ;;  %v358_v9 = vsel %vm357_vm1, %v350_v51, %v352_v6  ;;  %v359_v10 = vsel %vm357_vm1, %v352_v6, %v787_v50  ;;  %v440_v31 = vld [vmem:[#allocation3] sm:$0xff] }
 0x144   : > { %310 = vst [vmem:[#allocation3 + $0x8] sm:$0xf0] %v304_v7  ;;  %311 = vst [vmem:[#allocation3 + $0x10] sm:$0xf0] %v305_v8 }
 0x145   : > { %364 = vst [vmem:[#allocation3 + $0x30] sm:$0xf] %v358_v9  ;;  %365 = vst [vmem:[#allocation3 + $0x38] sm:$0xf] %v359_v10 }
 0x146   : > { %v336_v11 = vpop.permute.xlu1 %335  ;;  %v388_v12 = vpop.permute.xlu0 %387 }
 0x147   : > { %v341_v13 = vsel %vm339_vm0, %v334_v45, %v336_v11  ;;  %v342_v14 = vsel %vm339_vm0, %v336_v11, %v338_v48  ;;  %v394_v15 = vsel %vm393_vm2, %v386_v53, %v388_v12  ;;  %v395_v16 = vsel %vm393_vm2, %v388_v12, %v789_v52  ;;  %v443_v24 = vld [vmem:[#allocation3 + $0x18] sm:$0xff] }
 0x148   : > { %347 = vst [vmem:[#allocation3 + $0x20] sm:$0xf0] %v341_v13  ;;  %348 = vst [vmem:[#allocation3 + $0x28] sm:$0xf0] %v342_v14  ;;  %v455_v32 = vpack.c.bf16 %v443_v24, %v440_v31 }
 0x149   : > { %400 = vst [vmem:[#allocation3 + $0x48] sm:$0xf] %v394_v15  ;;  %401 = vst [vmem:[#allocation3 + $0x50] sm:$0xf] %v395_v16 }
 0x14a   : > { %v372_v17 = vpop.permute.xlu1 %371  ;;  %v320_v18 = vpop.permute.xlu0 %319 }
 0x14b   : > { %v377_v19 = vsel %vm375_vm12, %v370_v47, %v372_v17  ;;  %v378_v20 = vsel %vm375_vm12, %v372_v17, %v374_v62  ;;  %v324_v21 = vsel %vm321_vm14, %v318_v44, %v320_v18  ;;  %v441_v28 = vld [vmem:[#allocation3 + $0x8] sm:$0xff]  ;;  %v442_v37 = vld [vmem:[#allocation3 + $0x10] sm:$0xff] }
 0x14c   : > { %383 = vst [vmem:[#allocation3 + $0x38] sm:$0xf0] %v377_v19  ;;  %384 = vst [vmem:[#allocation3 + $0x40] sm:$0xf0] %v378_v20  ;;  %v446_v48 = vld [vmem:[#allocation3 + $0x30] sm:$0xff] }
 0x14d   : > { %330 = vst [vmem:[#allocation3 + $0x28] sm:$0xf] %v324_v21 }
 0x14e   : > { %v408_v22 = vpop.permute.xlu1 %407  ;;  %v356_v23 = vpop.permute.xlu0 %355 }
 0x14f   : > { %v413_v25 = vsel %vm411_vm13, %v785_v49, %v408_v22  ;;  %v414_v26 = vsel %vm411_vm13, %v408_v22, %v410_v2  ;;  %v360_v27 = vsel %vm357_vm1, %v787_v50, %v356_v23  ;;  %v444_v29 = vld [vmem:[#allocation3 + $0x20] sm:$0xff] }
 0x150   : > { %419 = vst [vmem:[#allocation3 + $0x50] sm:$0xf0] %v413_v25  ;;  %420 = vst [vmem:[#allocation3 + $0x58] sm:$0xf0] %v414_v26  ;;  %v456_v30 = vpack.c.bf16 %v444_v29, %v441_v28  ;;  %v449_v42 = vld [vmem:[#allocation3 + $0x48] sm:$0xff] }
 0x151   : > { %366 = vst [vmem:[#allocation3 + $0x40] sm:$0xf] %v360_v27  ;;  %v458_v49 = vpack.c.bf16 %v449_v42, %v446_v48 }
 0x152   : > { %v424_v33 = vpop.permute.xlu1 %423  ;;  %484 = vmatprep.subr.bf16.mxu0 %v456_v30  ;;  %v392_v34 = vpop.permute.xlu0 %391 }
 0x153   : > { %v430_v35 = vsel %vm429_vm3, %v791_v55, %v424_v33  ;;  %v396_v36 = vsel %vm393_vm2, %v789_v52, %v392_v34  ;;  %485 = vmatpush1.bf16.msra.mxu0 %v455_v32  ;;  %v447_v45 = vld [vmem:[#allocation3 + $0x38] sm:$0xff] }
 0x154   : > { %v445_v38 = vld [vmem:[#allocation3 + $0x28] sm:$0xff]  ;;  %436 = vst [vmem:[#allocation3 + $0x60] sm:$0xf] %v430_v35  ;;  %402 = vst [vmem:[#allocation3 + $0x58] sm:$0xf] %v396_v36 }
 0x155   : > { %v457_v39 = vpack.c.bf16 %v445_v38, %v442_v37 }
 0x156   : > { %v428_v40 = vpop.permute.xlu1 %427  ;;  %v426_v41 = vpop.permute.xlu0 %425 }
 0x157   : > { %651 = vmatpush3.bf16.msra.mxu1 %v457_v39  ;;  %v431_v43 = vsel %vm429_vm3, %v424_v33, %v426_v41  ;;  %v432_v44 = vsel %vm429_vm3, %v426_v41, %v428_v40  ;;  %v450_v46 = vld [vmem:[#allocation3 + $0x50] sm:$0xff] }
 0x158   : > { %652 = vmatprep.subr.bf16.mxu1 %v709_v0  ;;  %437 = vst [vmem:[#allocation3 + $0x68] sm:$0xf] %v431_v43  ;;  %438 = vst [vmem:[#allocation3 + $0x70] sm:$0xf] %v432_v44  ;;  %v459_v47 = vpack.c.bf16 %v450_v46, %v447_v45  ;;  %v448_v50 = vld [vmem:[#allocation3 + $0x40] sm:$0xff] }
 0x15a   : > { %486 = vmatprep.subr.bf16.mxu0 %v459_v47 }
 0x15b   : > { %487 = vmatpush1.bf16.msra.mxu0 %v458_v49  ;;  %v451_v51 = vld [vmem:[#allocation3 + $0x58] sm:$0xff]  ;;  %v452_v52 = vld [vmem:[#allocation3 + $0x60] sm:$0xf] }
 0x15c   : > { %v460_v53 = vpack.c.bf16 %v451_v51, %v448_v50  ;;  %v461_v54 = vpack.c.bf16 %v452_v52, %v452_v52 }
 0x15e   : > { %653 = vmatpush3.bf16.msra.mxu1 %v460_v53  ;;  %v476_v59 = vsel %vm474_vm4, %v461_v54, 0 }
 0x15f   : > { %v453_v55 = vld [vmem:[#allocation3 + $0x68] sm:$0xf]  ;;  %654 = vmatprep.subr.bf16.mxu1 %v709_v0  ;;  %v454_v56 = vld [vmem:[#allocation3 + $0x70] sm:$0xf] }
 0x160   : > { %v462_v57 = vpack.c.bf16 %v453_v55, %v453_v55  ;;  %v463_v58 = vpack.c.bf16 %v454_v56, %v454_v56 }
 0x162   : > { %640 = vmatprep.subr.msk.bf16.mxu0 %vm474_vm4, %v462_v57  ;;  %v482_v60 = vsel %vm474_vm4, %v463_v58, 0 }
 0x163   : > { %489 = vmatpush1.bf16.msra.mxu0 %v476_v59  ;;  %655 = vmatpush3.bf16.msra.mxu1 %v482_v60 }
 0x166   : > { %641 = vmatmul.mubr.msk.bf16.vlgmr.msra.gmra.mrb[0].mxu0 %vm470_vm5, %v439_v61  ;;  %657 = vmatmul.mubr.msk.bf16.vlgmr.msra.gmra.mrb[0].mxu1 %vm470_vm5, %v439_v61 }
 0x167   : > { %v468_v62 = vpop.permute.xlu0 %467 }
 0x239   : > { %v518_v63 = vpop.f32.mrb[0].mxu0  ;;  %v559_v1 = vpop.f32.mrb[0].mxu1 }
 0x23a   : > { %v519_v0 = vadd.f32 %v518_v63, %v468_v62  ;;  %v560_v2 = vadd.f32 %v559_v1, %v468_v62  ;;  %v520_v3 = vpop.f32.mrb[1].mxu0  ;;  %v658_v4 = vpop.f32.mrb[1].mxu1 }
 0x23b   : > { %v521_v5 = vadd.f32 %v520_v3, %v468_v62  ;;  %v522_v6 = vpop.f32.mrb[2].mxu0  ;;  %v562_v7 = vpop.f32.mrb[2].mxu1 }
 0x23c   : > { %vm565_vm6 = vcmp.ge.f32.partialorder %v519_v0, 0.0  ;;  %vm567_vm7 = vcmp.ge.f32.partialorder %v560_v2, 0.0  ;;  %v568_v8 = vmul.f32 0.2, %v519_v0  ;;  %v570_v9 = vmul.f32 0.2, %v560_v2 }
 0x23d   : > { %vm566_vm8 = vcmp.ge.f32.partialorder %v521_v5, 0.0  ;;  %v569_v10 = vmul.f32 0.2, %v521_v5  ;;  %v523_v11 = vpop.f32.mrb[3].mxu0  ;;  %v659_v12 = vpop.f32.mrb[3].mxu1 }
 0x23e   : > { %v571_v13 = vsel %vm565_vm6, %v519_v0, %v568_v8  ;;  %v573_v14 = vsel %vm567_vm7, %v560_v2, %v570_v9 }
 0x23f   : > { %574 = vst [vmem:[%s170_s24] sm:$0xff] %v571_v13  ;;  %576 = vst [vmem:[%s170_s24 + $0x10] sm:$0xff] %v573_v14  ;;  %v572_v15 = vsel %vm566_vm8, %v521_v5, %v569_v10 }
 0x240   : > { %575 = vst [vmem:[%s170_s24 + $0x8] sm:$0xff] %v572_v15 }
 0x241 PF: > { %s13_s12 = sadd.s32 1, %s707_s12  }
 0x242   : > { %p10_p4 = scmp.ge.s32.totalorder %s13_s12, 4  }
 0x244   :  { %12 = sbr.rel (!%p10_p4) target bundleno = 1 (0x1), region = 62 }

</bundles_post_ra>
